<compile_context>
chip_gen: v5e
topology: v5e:2x2
jax: 0.10.0
libtpu: 0.0.40
codegen_flags: <defaults>
</compile_context>

<pallas_src>
import functools
import numpy as np
import jax
import jax.numpy as jnp
from jax import lax
from jax.experimental import pallas as pl
from jax.experimental.pallas import tpu as pltpu

KH = 7        # conv1 kernel height
DIL = 3       # conv1 dilation along height
C = 10        # conv_kernel_num
NUM_COND = 6  # embedding vocabulary size


def _round_up(n, m):
    return ((n + m - 1) // m) * m


def prepare_constants(params, *, n_feature, embedding_dim, sequence_len, batch_size):
    """One-time (per-params) weight folding + packing into a single f32 buffer.

    Buffer layout (rows x max(C, B*H_out) cols):
      rows [0 : KH*Dext+1)            conv weight, embedding table folded into the
                                      one-hot columns, last row = conv bias
      rows [WS_OFF : WS_OFF+B*C+1)    predict weight with the PyTorch
                                      view/transpose scramble folded in, replicated
                                      H_out times along columns, last row = pred bias
    """
    E, F, B, S = embedding_dim, n_feature, batch_size, sequence_len
    Dext = NUM_COND + F
    H_out = S - DIL * (KH - 1)
    NOUT = B * H_out
    KROWS = KH * Dext + 1
    WS_OFF = _round_up(KROWS, 8)          # keep the predict block sublane-aligned
    WS_ROWS = B * C + 1
    ncols = max(C, NOUT)

    conv_w = np.asarray(params["conv_w"], np.float32)      # (C, 1, KH, E+F)
    emb_w = np.asarray(params["emb_w"], np.float32)        # (NUM_COND, E)
    conv_b = np.asarray(params["conv_b"], np.float32)      # (C,)
    pred_w = np.asarray(params["pred_w"], np.float32).reshape(C)
    pred_b = float(np.asarray(params["pred_b"], np.float32).reshape(()))

    w_taps = conv_w[:, 0]                                   # (C, KH, E+F)
    # embedding table folded into the conv weight (one-hot(cond) @ (emb_w @ Wemb))
    w_emb = np.einsum("ve,cke->kvc", emb_w, w_taps[:, :, :E]).astype(np.float32)
    w_feat = np.transpose(w_taps[:, :, E:], (1, 2, 0)).astype(np.float32)  # (KH,F,C)
    w_ext = np.concatenate([w_emb, w_feat], axis=1).reshape(KH * Dext, C)
    w_aug = np.concatenate([w_ext, conv_b.reshape(1, C)], axis=0)          # (KROWS, C)

    # predict Linear(10->1) with the `.view(10,-1).transpose(0,1)` scramble:
    # out[bj*H_out + h] = pb + sum_r pred_w[r] * c2[h, r*B + bj]
    ws = np.zeros((WS_ROWS, B), np.float32)
    for r in range(C):
        for bj in range(B):
            ws[r * B + bj, bj] = pred_w[r]
    ws[B * C, :] = pred_b
    ws_big = np.repeat(ws, H_out, axis=1)                                  # (WS_ROWS, NOUT)

    consts = np.zeros((WS_OFF + WS_ROWS, ncols), np.float32)
    consts[:KROWS, :C] = w_aug
    consts[WS_OFF:WS_OFF + WS_ROWS, :NOUT] = ws_big
    return jnp.asarray(consts)


def make_forward(n_feature, embedding_dim, sequence_len, batch_size):
    F, E, S, B = n_feature, embedding_dim, sequence_len, batch_size
    BS = B * S
    Dext = NUM_COND + F
    H_out = S - DIL * (KH - 1)
    assert H_out > 0, "sequence_len must exceed the dilated receptive field (19)"
    L = BS - DIL * (KH - 1)          # rows of the fused im2col slab
    KROWS = KH * Dext + 1            # conv weight rows incl. bias row
    WS_OFF = _round_up(KROWS, 8)     # sublane-aligned offset of predict weight
    WS_ROWS = B * C + 1
    NOUT = B * H_out

    def fused_kernel(cond_ref, x_ref, const_ref, out_ref):
        # cond_ref : (B*S, 1) int32   condition ids
        # x_ref    : (B*S, F) f32     raw features
        # const_ref: packed weights   (see prepare_constants)
        # out_ref  : (1, B*H_out) f32 final flat output layout
        #
        # (a) embedding lookup as a one-hot; the table is folded into const_ref.
        onehot = (lax.broadcasted_iota(jnp.int32, (BS, NUM_COND), 1)
                  == cond_ref[...]).astype(jnp.float32)
        xext = jnp.concatenate([onehot, x_ref[...]], axis=1)          # (BS, Dext)

        # (b) dilated Conv2d(1, C, (KH, D), dilation=(DIL, 1)) as ONE matmul on an
        #     im2col slab; bias rides along as a ones column.
        pieces = [xext[kh * DIL: kh * DIL + L, :] for kh in range(KH)]
        pieces.append(jnp.full((L, 1), 1.0, jnp.float32))
        slab = jnp.concatenate(pieces, axis=1)                        # (L, KROWS)
        conv = jnp.maximum(
            jnp.dot(slab, const_ref[0:KROWS, 0:C],
                    preferred_element_type=jnp.float32), 0.0)         # (L, C)

        # (c) predict Linear + batch/channel scramble as ONE matmul: per-batch
        #     valid conv rows side by side along lanes, ones column = pred bias.
        cpieces = [conv[b * S: b * S + H_out, :] for b in range(B)]
        cpieces.append(jnp.full((H_out, 1), 1.0, jnp.float32))
        c2 = jnp.concatenate(cpieces, axis=1)                         # (H_out, B*C+1)
        ybig = jnp.dot(c2, const_ref[WS_OFF:WS_OFF + WS_ROWS, 0:NOUT],
                       preferred_element_type=jnp.float32)            # (H_out, NOUT)

        # (d) the answer for flat index j = bj*H_out + h is ybig[h, j]; pick the
        #     per-block diagonal with an eye mask + sublane reduce so the output
        #     is already in its final layout (no transpose anywhere).
        eye = (lax.broadcasted_iota(jnp.int32, (H_out, H_out), 0)
               == lax.broadcasted_iota(jnp.int32, (H_out, H_out), 1)
               ).astype(jnp.float32)
        mask = jnp.concatenate([eye] * B, axis=1)                     # (H_out, NOUT)
        out_ref[...] = jnp.sum(ybig * mask, axis=0, keepdims=True)    # (1, NOUT)

    vmem = functools.partial(pl.BlockSpec, memory_space=pltpu.MemorySpace.VMEM)

    call = pl.pallas_call(
        fused_kernel,
        out_shape=jax.ShapeDtypeStruct((1, NOUT), jnp.float32),
        in_specs=[vmem(), vmem(), vmem()],
        out_specs=vmem(),
    )

    def forward(consts, x, condition):
        cond2d = condition.astype(jnp.int32).reshape(BS, 1)
        y = call(cond2d, x.astype(jnp.float32), consts)
        return y.reshape(-1)                                          # (B*H_out,)

    return jax.jit(forward)


class NetPallas:
    def __init__(self, n_feature, embedding_dim, n_hidden, sequence_len,
                 batch_size, key):
        self.n_feature = n_feature
        self.embedding_dim = embedding_dim
        self.n_hidden = n_hidden
        self.sequence_len = sequence_len
        self.batch = batch_size
        D = n_feature + embedding_dim
        k = jax.random.split(key, 4)
        # deterministic synthetic params (shapes from nn.Module.__init__)
        self.params = {
            "emb_w": jax.random.normal(k[0], (NUM_COND, embedding_dim), jnp.float32) * 0.1,
            "conv_w": jax.random.normal(k[1], (C, 1, KH, D), jnp.float32) * 0.1,
            "conv_b": jax.random.normal(k[2], (C,), jnp.float32) * 0.1,
            "pred_w": jax.random.normal(k[3], (1, C), jnp.float32) * 0.1,
            "pred_b": jnp.zeros((1,), jnp.float32),
        }
        # all weight prep done ONCE here (nothing param-derived in the call path)
        self._consts = prepare_constants(
            self.params, n_feature=n_feature, embedding_dim=embedding_dim,
            sequence_len=sequence_len, batch_size=batch_size)
        self._forward = make_forward(n_feature, embedding_dim, sequence_len,
                                     batch_size)

    def forward(self, x, condition, train=False):
        return self._forward(self._consts, x, condition)


def reference_forward(params, x, condition, *, batch, sequence_len):
    """Pure-JAX replica of the PyTorch forward (for correctness checking)."""
    hi = jax.lax.Precision.HIGHEST
    emb = jnp.take(params["emb_w"], condition, axis=0)
    xc = jnp.concatenate([emb, x], axis=1)
    B, S = batch, sequence_len
    D = xc.shape[1]
    xr = xc.reshape(B, S, D)
    H_out = S - DIL * (KH - 1)
    taps = jnp.stack([xr[:, kh * DIL: kh * DIL + H_out, :] for kh in range(KH)],
                     axis=2)                                    # (B, H_out, KH, D)
    conv = jnp.einsum("bhkd,ckd->bch", taps, params["conv_w"][:, 0], precision=hi) \
        + params["conv_b"][None, :, None]
    conv = jnp.maximum(conv, 0.0)                               # (B, C, H_out)
    cnn = conv.reshape(C, B * H_out).T                          # .view(10,-1).transpose(0,1)
    y = jnp.dot(cnn, params["pred_w"].T, precision=hi) + params["pred_b"]
    return y.reshape(-1)


if __name__ == "__main__":
    # sequence_len must exceed the dilated conv receptive field (3*(7-1)+1 = 19)
    n_feature, embedding_dim, n_hidden = 4, 3, 32
    sequence_len, batch = 22, 2

    key = jax.random.PRNGKey(0)
    kx, kc, kp = jax.random.split(key, 3)
    N = batch * sequence_len
    x = jax.random.normal(kx, (N, n_feature), jnp.float32)
    condition = jax.random.randint(kc, (N,), 0, NUM_COND)

    net = NetPallas(n_feature, embedding_dim, n_hidden, sequence_len, batch, kp)
    out = jax.block_until_ready(net.forward(x, condition, train=False))

    H_out = sequence_len - DIL * (KH - 1)
    assert out.shape == (batch * H_out,)
    assert out.dtype == jnp.float32

    ref = reference_forward(net.params, x, condition,
                            batch=batch, sequence_len=sequence_len)
    np.testing.assert_allclose(np.asarray(out), np.asarray(ref),
                               rtol=1e-5, atol=1e-5)
    print("KERNEL_OK")
</pallas_src>

<mosaic_0001>
module attributes {stable_mosaic.version = 11 : i64} {
  func.func @fused_kernel(%arg0: memref<44x1xi32, #tpu.memory_space<vmem>>, %arg1: memref<44x4xf32, #tpu.memory_space<vmem>>, %arg2: memref<93x10xf32, #tpu.memory_space<vmem>>, %arg3: memref<1x8xf32, #tpu.memory_space<vmem>>) attributes {dimension_semantics = [], scalar_prefetch = 0 : i64, scratch_operands = 0 : i64, tpu.core_type = #tpu.core_type<tc>} {
    %0 = tpu.iota {dimensions = array<i32: 1>} : vector<44x6xi32>
    %c0 = arith.constant 0 : index
    %c0_0 = arith.constant 0 : index
    %1 = vector.load %arg0[%c0, %c0_0] : memref<44x1xi32, #tpu.memory_space<vmem>>, vector<44x1xi32>
    %2 = vector.broadcast %1 : vector<44x1xi32> to vector<44x6xi32>
    %3 = arith.cmpi eq, %0, %2 : vector<44x6xi32>
    %4 = arith.extui %3 : vector<44x6xi1> to vector<44x6xi32>
    %5 = arith.sitofp %4 : vector<44x6xi32> to vector<44x6xf32>
    %c0_1 = arith.constant 0 : index
    %c0_2 = arith.constant 0 : index
    %6 = vector.load %arg1[%c0_1, %c0_2] : memref<44x4xf32, #tpu.memory_space<vmem>>, vector<44x4xf32>
    %7 = tpu.concatenate %5, %6 in 1 : vector<44x6xf32>, vector<44x4xf32> -> vector<44x10xf32>
    %8 = vector.extract_strided_slice %7 {offsets = [0, 0], sizes = [26, 10], strides = [1, 1]} : vector<44x10xf32> to vector<26x10xf32>
    %9 = vector.extract_strided_slice %7 {offsets = [3, 0], sizes = [26, 10], strides = [1, 1]} : vector<44x10xf32> to vector<26x10xf32>
    %10 = vector.extract_strided_slice %7 {offsets = [6, 0], sizes = [26, 10], strides = [1, 1]} : vector<44x10xf32> to vector<26x10xf32>
    %11 = vector.extract_strided_slice %7 {offsets = [9, 0], sizes = [26, 10], strides = [1, 1]} : vector<44x10xf32> to vector<26x10xf32>
    %12 = vector.extract_strided_slice %7 {offsets = [12, 0], sizes = [26, 10], strides = [1, 1]} : vector<44x10xf32> to vector<26x10xf32>
    %13 = vector.extract_strided_slice %7 {offsets = [15, 0], sizes = [26, 10], strides = [1, 1]} : vector<44x10xf32> to vector<26x10xf32>
    %14 = vector.extract_strided_slice %7 {offsets = [18, 0], sizes = [26, 10], strides = [1, 1]} : vector<44x10xf32> to vector<26x10xf32>
    %cst = arith.constant 1.000000e+00 : f32
    %15 = vector.broadcast %cst : f32 to vector<26x1xf32>
    %16 = tpu.concatenate %8, %9, %10, %11, %12, %13, %14, %15 in 1 : vector<26x10xf32>, vector<26x10xf32>, vector<26x10xf32>, vector<26x10xf32>, vector<26x10xf32>, vector<26x10xf32>, vector<26x10xf32>, vector<26x1xf32> -> vector<26x71xf32>
    %c0_3 = arith.constant 0 : index
    %c0_4 = arith.constant 0 : index
    %17 = vector.load %arg2[%c0_3, %c0_4] : memref<93x10xf32, #tpu.memory_space<vmem>>, vector<71x10xf32>
    %cst_5 = arith.constant dense<0.000000e+00> : vector<26x10xf32>
    %18 = tpu.matmul %16, %17, %cst_5 {dimension_numbers = #tpu.dot_dimension_numbers<[1], [0], [0], [1], [0, 0, 1, 1], [], []>} : vector<26x71xf32>, vector<71x10xf32>, vector<26x10xf32> -> vector<26x10xf32>
    %cst_6 = arith.constant 0.000000e+00 : f32
    %19 = vector.broadcast %cst_6 : f32 to vector<26x10xf32>
    %20 = arith.maximumf %18, %19 : vector<26x10xf32>
    %21 = vector.extract_strided_slice %20 {offsets = [0, 0], sizes = [4, 10], strides = [1, 1]} : vector<26x10xf32> to vector<4x10xf32>
    %22 = vector.extract_strided_slice %20 {offsets = [22, 0], sizes = [4, 10], strides = [1, 1]} : vector<26x10xf32> to vector<4x10xf32>
    %cst_7 = arith.constant 1.000000e+00 : f32
    %23 = vector.broadcast %cst_7 : f32 to vector<4x1xf32>
    %24 = tpu.concatenate %21, %22, %23 in 1 : vector<4x10xf32>, vector<4x10xf32>, vector<4x1xf32> -> vector<4x21xf32>
    %c72 = arith.constant 72 : index
    %c0_8 = arith.constant 0 : index
    %25 = vector.load %arg2[%c72, %c0_8] : memref<93x10xf32, #tpu.memory_space<vmem>>, vector<21x8xf32>
    %cst_9 = arith.constant dense<0.000000e+00> : vector<4x8xf32>
    %26 = tpu.matmul %24, %25, %cst_9 {dimension_numbers = #tpu.dot_dimension_numbers<[1], [0], [0], [1], [0, 0, 1, 1], [], []>} : vector<4x21xf32>, vector<21x8xf32>, vector<4x8xf32> -> vector<4x8xf32>
    %27 = tpu.iota {dimensions = array<i32: 0>} : vector<4x4xi32>
    %28 = tpu.iota {dimensions = array<i32: 1>} : vector<4x4xi32>
    %29 = arith.cmpi eq, %27, %28 : vector<4x4xi32>
    %30 = arith.extui %29 : vector<4x4xi1> to vector<4x4xi32>
    %31 = arith.sitofp %30 : vector<4x4xi32> to vector<4x4xf32>
    %32 = tpu.concatenate %31, %31 in 1 : vector<4x4xf32>, vector<4x4xf32> -> vector<4x8xf32>
    %33 = arith.mulf %26, %32 : vector<4x8xf32>
    %cst_10 = arith.constant dense<0.000000e+00> : vector<8xf32>
    %34 = vector.multi_reduction <add>, %33, %cst_10 [0] : vector<4x8xf32> to vector<8xf32>
    %35 = vector.shape_cast %34 : vector<8xf32> to vector<1x8xf32>
    %c0_11 = arith.constant 0 : index
    %c0_12 = arith.constant 0 : index
    %36 = vector.load %arg3[%c0_11, %c0_12] : memref<1x8xf32, #tpu.memory_space<vmem>>, vector<1x8xf32>
    tpu.vector_store %arg3[%c0_11, %c0_12], %35 {strides = array<i32>} : memref<1x8xf32, #tpu.memory_space<vmem>>, vector<1x8xf32>,
    return
  }
}

</mosaic_0001>

<bundles_post_ra>
// kernel: forward.1
= control target key start
LH: loop header
LB: loop body
LE: loop exit
PB: predicated region body
PF: predicated region fallthrough
CT: control target
= control target key end

     0   :  { %v465_v2 = vmov 0   ;;  %s740_s0 = inlined_call_operand.vmem [shape: s32[44,1], index: 0, kind: input, shape index: {}]   ;;  %s741_s1 = inlined_call_operand.vmem [shape: f32[44,4], index: 1, kind: input, shape index: {}]   ;;  %s742_s2 = inlined_call_operand.vmem [shape: f32[93,10], index: 2, kind: input, shape index: {}]   ;;  %s743_s3 = inlined_call_operand.hbm [shape: f32[1,8], index: 3, kind: output, shape index: {}]  }
   0x1   :  { %v21_v0 = vld [vmem:[%s740_s0 + $0x20] sm:$0xff]  ;;  %v19_v1 = vld [vmem:[%s740_s0 + $0x10] sm:$0xff]  ;;  %437 = vset.pattern.permute.xlu1 %v465_v2  ;;  %436 = vset.pattern.permute.xlu0 %v465_v2  ;;  %v62_v3 = vld [vmem:[%s741_s1 + $0x18] sm:$0xff] }
   0x2   :  { %36 = vperm.xlu1 %437, %v21_v0   ;;  %30 = vperm.xlu0 %436, %v19_v1  }
   0x3   :  { %8 = vsyncpa [#allocation3], 0  ;;  %s466_s18 = smov 6   ;;  %438 = vset.pattern.permute.xlu2 %v465_v2  ;;  %v61_v4 = vld [vmem:[%s741_s1 + $0x10] sm:$0xff]  ;;  %v20_v5 = vld [vmem:[%s740_s0 + $0x18] sm:$0xff]  ;;  %v15_v11 = vlaneseq  ;;  %vm89_vm0 = vcmask 48128  }
   0x4   :  { %77 = vrot.lane.b32.xlu2 %v62_v3, %s466_s18  ;;  %v63_v6 = vld [vmem:[%s741_s1 + $0x20] sm:$0xff]  ;;  %v22_v7 = vld [vmem:[%s740_s0 + $0x28] sm:$0xf]  ;;  %v467_v16 = vmov 0.0   ;;  %s468_s4 = smov 30   ;;  %vm141_vm4 = vcmask 1046528  }
   0x5   :  { %v64_v8 = vld [vmem:[%s741_s1 + $0x28] sm:$0xf]  ;;  %v17_v9 = vld [vmem:[%s740_s0] sm:$0xff]  ;;  %v528_v12 = vand.u32 127, %v15_v11  ;;  %vm204_vm5 = vcmask 1045504   ;;  %s469_s5 = smov 20  }
   0x6   :  { %s470_s6 = smov 10   ;;  %vm120_vm7 = vcmask 1041408   ;;  %vm100_vm8 = vcmask 1044480   ;;  %s471_s7 = smov 40   ;;  %vm182_vm9 = vcmask 1040384   ;;  %vm161_vm10 = vcmask 1043456  }
   0x7   :  { %s472_s8 = smov 50   ;;  %s473_s9 = smov 60   ;;  %v18_v50 = vld [vmem:[%s740_s0 + $0x8] sm:$0xff]  ;;  %v59_v53 = vld [vmem:[%s741_s1] sm:$0xff]  ;;  %v266_v55 = vld [vmem:[%s742_s2 + $0x38] sm:$0xff]  ;;  %vm224_vm11 = vcmask 80896  }
   0x8   :  { %v60_v51 = vld [vmem:[%s741_s1 + $0x8] sm:$0xff]  ;;  %v267_v54 = vld [vmem:[%s742_s2 + $0x40] sm:$0x7f]  ;;  %v265_v56 = vld [vmem:[%s742_s2 + $0x30] sm:$0xff]  ;;  %vm229_vm12 = vcmask 162816   ;;  %vm234_vm13 = vcmask 244736  }
   0x9   :  { %408 = vmatpush.msk.msra.mxu3 %vm141_vm4, %v267_v54  ;;  %399 = vmatpush.msk.msra.mxu0 %vm141_vm4, %v267_v54  ;;  %v264_v58 = vld [vmem:[%s742_s2 + $0x28] sm:$0xff]  ;;  %v263_v59 = vld [vmem:[%s742_s2 + $0x20] sm:$0xff]  ;;  %v262_v60 = vld [vmem:[%s742_s2 + $0x18] sm:$0xff]  ;;  %vm239_vm14 = vcmask 326656   ;;  %vm744_vm15 = vcmask 408576   ;;  %s384_s15 = sshll.u32 %s743_s3, 4  ;;  %s385_s15 = int_to_ptr.hbm [resolvable:$true] %s384_s15 }
   0xa   :  { %75 = vrot.lane.b32.xlu1 %v61_v4, %s466_s18  ;;  %33 = vperm.xlu0 %436, %v20_v5   ;;  %v261_v61 = vld [vmem:[%s742_s2 + $0x10] sm:$0xff]  ;;  %v260_v63 = vld [vmem:[%s742_s2 + $0x8] sm:$0xff]  ;;  %v259_v0 = vld [vmem:[%s742_s2] sm:$0xff] }
   0xb   :  { %407 = vmatpush.msk.msra.mxu2 %vm141_vm4, %v267_v54  ;;  %410 = vmatpush.msra.mxu3 %v266_v55 }
   0xc   :  { %79 = vrot.lane.b32.xlu2 %v63_v6, %s466_s18  ;;  %292 = vmatpush.msra.mxu0 %v266_v55 }
   0xd   :  { %409 = vmatpush.msra.mxu2 %v266_v55  ;;  %412 = vmatpush.msra.mxu3 %v265_v56 }
   0xe   :  { %293 = vmatpush.msra.mxu0 %v265_v56 }
   0xf   :  { %411 = vmatpush.msra.mxu2 %v265_v56  ;;  %414 = vmatpush.msra.mxu3 %v264_v58 }
  0x10   :  { %294 = vmatpush.msra.mxu0 %v264_v58 }
  0x11   :  { %413 = vmatpush.msra.mxu2 %v264_v58  ;;  %416 = vmatpush.msra.mxu3 %v263_v59 }
  0x12   :  { %39 = vperm.xlu0 %436, %v22_v7   ;;  %81 = vrot.lane.b32.xlu1 %v64_v8, %s466_s18 }
  0x13   :  { %295 = vmatpush.msra.mxu0 %v263_v59  ;;  %415 = vmatpush.msra.mxu2 %v263_v59 }
  0x14   :  { %24 = vperm.xlu2 %438, %v17_v9   ;;  %418 = vmatpush.msra.mxu3 %v262_v60 }
  0x15   :  { %296 = vmatpush.msra.mxu0 %v262_v60  ;;  %417 = vmatpush.msra.mxu2 %v262_v60 }
  0x16   :  { %420 = vmatpush.msra.mxu3 %v261_v61 }
  0x17   :  { %297 = vmatpush.msra.mxu0 %v261_v61  ;;  %419 = vmatpush.msra.mxu2 %v261_v61 }
  0x18   :  { %422 = vmatpush.msra.mxu3 %v260_v63 }
  0x19   :  { %298 = vmatpush.msra.mxu0 %v260_v63  ;;  %421 = vmatpush.msra.mxu2 %v260_v63 }
  0x1a   :  { %424 = vmatpush.msra.mxu3 %v259_v0 }
  0x1b   :  { %299 = vmatpush.msra.mxu0 %v259_v0  ;;  %423 = vmatpush.msra.mxu2 %v259_v0 }
  0x5e   :  { %v78_v10 = vpop.permute.xlu2 %77 }
  0x66   :  { %v80_v13 = vpop.permute.xlu2 %79 }
  0x6e   :  { %v611_v57 = vpop.permute.xlu2 %24 }
  0x74   :  { %v37_v14 = vpop.permute.xlu1 %36  ;;  %v31_v15 = vpop.permute.xlu0 %30 }
  0x75   :  { %vm45_vm1 = vcmp.eq.s32.totalorder %v528_v12, %v37_v14  ;;  %vm43_vm3 = vcmp.eq.s32.totalorder %v528_v12, %v31_v15 }
  0x76   :  { %v397_v17 = vsel %vm45_vm1, 1.0, %v467_v16  ;;  %v395_v30 = vsel %vm43_vm3, 1.0, %v467_v16  ;;  %vm249_vm1 = vcmask 490496   ;;  %vm254_vm3 = vcmask 572416  }
  0x77   :  { %v94_v18 = vsel %vm89_vm0, %v397_v17, %v80_v13 }
  0x78   :  { %v147_v19 = vrot.slane %v94_v18, 1  ;;  %v208_v23 = vrot.slane %v94_v18, 2  ;;  %v167_v40 = vrot.slane %v94_v18, 4  ;;  %v188_v42 = vrot.slane %v94_v18, 7 }
  0x7a   :  { %155 = vrot.lane.b32.xlu1 %v147_v19, %s468_s4 }
  0x7c   :  { %v34_v20 = vpop.permute.xlu0 %33  ;;  %v76_v24 = vpop.permute.xlu1 %75 }
  0x7d   :  { %vm44_vm2 = vcmp.eq.s32.totalorder %v528_v12, %v34_v20  ;;  %v552_v31 = vsel %vm89_vm0, %v395_v30, %v76_v24 }
  0x7e   :  { %v396_v21 = vsel %vm44_vm2, 1.0, %v467_v16  ;;  %v124_v34 = vrot.slane %v552_v31, 6  ;;  %v104_v35 = vrot.slane %v552_v31, 3  ;;  %vm268_vm2 = vcmask 580608  }
  0x7f   :  { %v538_v22 = vsel %vm89_vm0, %v396_v21, %v78_v10  ;;  %v205_v54 = vrot.slane %v552_v31, 2  ;;  %v184_v58 = vrot.slane %v552_v31, 7  ;;  %v163_v59 = vrot.slane %v552_v31, 4 }
  0x80   :  { %v126_v25 = vrot.slane %v538_v22, 6  ;;  %v106_v26 = vrot.slane %v538_v22, 3  ;;  %v145_v27 = vrot.slane %v538_v22, 1  ;;  %v206_v28 = vrot.slane %v538_v22, 2 }
  0x81   :  { %v186_v43 = vrot.slane %v538_v22, 7  ;;  %v165_v44 = vrot.slane %v538_v22, 4 }
  0x82   :  { %134 = vrot.lane.b32.xlu0 %v126_v25, %s469_s5  ;;  %114 = vrot.lane.b32.xlu2 %v106_v26, %s470_s6  ;;  %v148_v29 = vsel %vm141_vm4, %v145_v27, %v147_v19  ;;  %v557_v33 = vsel %vm204_vm5, %v206_v28, %v208_v23  ;;  %v127_v38 = vsel %vm120_vm7, %v124_v34, %v126_v25 }
  0x83   :  { %153 = vrot.lane.b32.xlu1 %v148_v29, %s468_s4  ;;  %v107_v39 = vsel %vm100_vm8, %v104_v35, %v106_v26  ;;  %v189_v46 = vsel %vm182_vm9, %v186_v43, %v188_v42  ;;  %v168_v47 = vsel %vm161_vm10, %v165_v44, %v167_v40  ;;  %v207_v55 = vsel %vm204_vm5, %v205_v54, %v206_v28 }
  0x84   :  { %v40_v32 = vpop.permute.xlu0 %39  ;;  %v82_v37 = vpop.permute.xlu1 %81  ;;  %v187_v63 = vsel %vm182_vm9, %v184_v58, %v186_v43  ;;  %v166_v0 = vsel %vm161_vm10, %v163_v59, %v165_v44 }
  0x85   :  { %vm46_vm6 = vcmp.eq.s32.totalorder %v528_v12, %v40_v32 }
  0x86   :  { %v398_v36 = vsel %vm46_vm6, 1.0, %v467_v16 }
  0x87   :  { %v95_v41 = vsel %vm89_vm0, %v398_v36, %v82_v37 }
  0x88   :  { %v210_v45 = vrot.slane %v95_v41, 2  ;;  %v190_v49 = vrot.slane %v95_v41, 7  ;;  %v143_v41 = vrot.slane %v552_v31, 1 }
  0x8a   :  { %132 = vrot.lane.b32.xlu0 %v127_v38, %s469_s5  ;;  %112 = vrot.lane.b32.xlu2 %v107_v39, %s470_s6  ;;  %v211_v48 = vsel %vm204_vm5, %v208_v23, %v210_v45  ;;  %v191_v52 = vsel %vm182_vm9, %v188_v42, %v190_v49  ;;  %vm328_vm5 = vcmask 171008  }
  0x8b   :  { %175 = vrot.lane.b32.xlu1 %v167_v40, %s471_s7 }
  0x92   :  { %196 = vrot.lane.b32.xlu0 %v189_v46, %s472_s8  ;;  %173 = vrot.lane.b32.xlu2 %v168_v47, %s471_s7 }
  0x93   :  { %216 = vrot.lane.b32.xlu1 %v211_v48, %s473_s9 }
  0x9a   :  { %27 = vperm.xlu0 %436, %v18_v50   ;;  %198 = vrot.lane.b32.xlu2 %v191_v52, %s472_s8 }
  0x9b   :  { %73 = vrot.lane.b32.xlu1 %v60_v51, %s466_s18 }
  0xa2   :  { %71 = vrot.lane.b32.xlu0 %v59_v53, %s466_s18  ;;  %218 = vrot.lane.b32.xlu2 %v210_v45, %s473_s9 }
  0xdc   :  { %v115_v62 = vpop.permute.xlu2 %114 }
  0xdd   :  { %v228_v10 = vsel %vm224_vm11, %v538_v22, %v115_v62  ;;  %v325_v22 = vld [vmem:[%s742_s2 + $0x48] sm:$0xff] }
  0xe4   :  { %v113_v2 = vpop.permute.xlu2 %112 }
  0xe5   :  { %v227_v7 = vsel %vm224_vm11, %v552_v31, %v113_v2 }
  0xec   :  { %v156_v1 = vpop.permute.xlu1 %155  ;;  %v174_v5 = vpop.permute.xlu2 %173 }
  0xf4   :  { %v135_v3 = vpop.permute.xlu0 %134  ;;  %v199_v13 = vpop.permute.xlu2 %198 }
  0xf5   :  { %v154_v4 = vpop.permute.xlu1 %153  ;;  %v233_v15 = vsel %vm229_vm12, %v228_v10, %v135_v3 }
  0xf6   :  { %v238_v19 = vsel %vm234_vm13, %v233_v15, %v156_v1 }
  0xfc   :  { %v133_v6 = vpop.permute.xlu0 %132  ;;  %v219_v29 = vpop.permute.xlu2 %218 }
  0xfd   :  { %v176_v8 = vpop.permute.xlu1 %175  ;;  %v232_v9 = vsel %vm229_vm12, %v227_v7, %v133_v6 }
  0xfe   :  { %v237_v14 = vsel %vm234_vm13, %v232_v9, %v154_v4  ;;  %v243_v23 = vsel %vm239_vm14, %v238_v19, %v176_v8  ;;  %v146_v19 = vsel %vm141_vm4, %v143_v41, %v145_v27  ;;  %v356_v27 = vshrl.u32 %v15_v11, 7 }
  0xff   :  { %v242_v18 = vsel %vm239_vm14, %v237_v14, %v174_v5  ;;  %v248_v26 = vsel %vm744_vm15, %v243_v23, %v199_v13 }
 0x100   :  { %v253_v32 = vsel %vm249_vm1, %v248_v26, %v219_v29 }
 0x101   :  { %v258_v39 = vsel %vm254_vm3, %v253_v32, 1.0 }
 0x104   :  { %v197_v17 = vpop.permute.xlu0 %196 }
 0x105   :  { %v247_v20 = vsel %vm744_vm15, %v242_v18, %v197_v17  ;;  %v217_v21 = vpop.permute.xlu1 %216  ;;  %vm41_vm15 = vcmp.eq.s32.totalorder %v528_v12, %v611_v57 }
 0x106   :  { %v252_v24 = vsel %vm249_vm1, %v247_v20, %v217_v21  ;;  %v393_v45 = vsel %vm41_vm15, 1.0, %v467_v16  ;;  %v327_v20 = vld [vmem:[%s742_s2 + $0x58] sm:$0x1f]  ;;  %v326_v21 = vld [vmem:[%s742_s2 + $0x50] sm:$0xff]  ;;  %s475_s2 = smov [#allocation2]  }
 0x107   :  { %v257_v25 = vsel %vm254_vm3, %v252_v24, 1.0  ;;  %404 = vmatpush.msk.msra.mxu1 %vm100_vm8, %v327_v20 }
 0x108   :  { %402 = vmatmul.msk.f32.vlgmr.msra.gmra.mxu3 %vm268_vm2, %v257_v25 }
 0x109   :  { %349 = vmatpush.msra.mxu1 %v326_v21 }
 0x10b   :  { %350 = vmatpush.msra.mxu1 %v325_v22 }
 0x10c   :  { %v28_v30 = vpop.permute.xlu0 %27 }
 0x10d   :  { %vm42_vm6 = vcmp.eq.s32.totalorder %v528_v12, %v28_v30  ;;  %v74_v36 = vpop.permute.xlu1 %73 }
 0x10e   :  { %v394_v37 = vsel %vm42_vm6, 1.0, %v467_v16 }
 0x10f   :  { %v650_v38 = vsel %vm89_vm0, %v394_v37, %v74_v36 }
 0x110   :  { %403 = vmatmul.msk.f32.gmra.mxu3 %vm268_vm2, %v258_v39  ;;  %v142_v40 = vrot.slane %v650_v38, 1  ;;  %v122_v50 = vrot.slane %v650_v38, 6  ;;  %v102_v51 = vrot.slane %v650_v38, 3  ;;  %v183_v56 = vrot.slane %v650_v38, 7 }
 0x111   :  { %v162_v57 = vrot.slane %v650_v38, 4 }
 0x112   :  { %v144_v42 = vsel %vm141_vm4, %v142_v40, %v143_v41  ;;  %v185_v60 = vsel %vm182_vm9, %v183_v56, %v184_v58  ;;  %v125_v28 = vsel %vm120_vm7, %v122_v50, %v124_v34  ;;  %v105_v62 = vsel %vm100_vm8, %v102_v51, %v104_v35 }
 0x113   :  { %149 = vrot.lane.b32.xlu2 %v144_v42, %s468_s4  ;;  %v164_v61 = vsel %vm161_vm10, %v162_v57, %v163_v59  ;;  %vm357_vm4 = vcmp.eq.s32.totalorder %v356_v27, %v528_v12  ;;  %vm367_vm9 = vcmask 60416   ;;  %vm375_vm10 = vcmask 57344  }
 0x114   :  { %v72_v46 = vpop.permute.xlu0 %71 }
 0x115   :  { %v90_v47 = vsel %vm89_vm0, %v393_v45, %v72_v46  ;;  %vm745_vm0 = vcmask 408576  }
 0x116   :  { %v101_v48 = vrot.slane %v90_v47, 3  ;;  %v121_v49 = vrot.slane %v90_v47, 6 }
 0x118   :  { %v123_v52 = vsel %vm120_vm7, %v121_v49, %v122_v50  ;;  %v103_v53 = vsel %vm100_vm8, %v101_v48, %v102_v51  ;;  %vm364_vm8 = vcmask 31744  }
 0x119   :  { %128 = vrot.lane.b32.xlu1 %v123_v52, %s469_s5  ;;  %108 = vrot.lane.b32.xlu0 %v103_v53, %s470_s6 }
 0x11b   :  { %212 = vrot.lane.b32.xlu2 %v207_v55, %s473_s9 }
 0x121   :  { %192 = vrot.lane.b32.xlu1 %v185_v60, %s472_s8  ;;  %169 = vrot.lane.b32.xlu0 %v164_v61, %s471_s7 }
 0x123   :  { %130 = vrot.lane.b32.xlu2 %v125_v28, %s469_s5 }
 0x129   :  { %110 = vrot.lane.b32.xlu1 %v105_v62, %s470_s6 }
 0x12b   :  { %194 = vrot.lane.b32.xlu2 %v187_v63, %s472_s8 }
 0x131   :  { %171 = vrot.lane.b32.xlu1 %v166_v0, %s471_s7 }
 0x16d   :  { %v150_v2 = vpop.permute.xlu2 %149 }
 0x175   :  { %v213_v44 = vpop.permute.xlu2 %212 }
 0x17d   :  { %v131_v25 = vpop.permute.xlu2 %130 }
 0x185   :  { %v195_v39 = vpop.permute.xlu2 %194 }
 0x18b   :  { %v306_v34 = vpop.f32.mrf.mxu3  ;;  %v129_v1 = vpop.permute.xlu1 %128 }
 0x18c   :  { %v109_v31 = vpop.permute.xlu0 %108  ;;  %v313_v4 = vmax.f32 %v306_v34, 0.0 }
 0x18d   :  { %v225_v35 = vsel %vm224_vm11, %v90_v47, %v109_v31 }
 0x18e   :  { %v230_v3 = vsel %vm229_vm12, %v225_v35, %v129_v1  ;;  %v317_v10 = vrot.slane %v313_v4, 6 }
 0x18f   :  { %v235_v7 = vsel %vm234_vm13, %v230_v3, %v150_v2 }
 0x193   :  { %v309_v5 = vpop.f32.mrf.mxu3  ;;  %v193_v6 = vpop.permute.xlu1 %192 }
 0x194   :  { %v314_v43 = vmax.f32 %v309_v5, 0.0  ;;  %v170_v8 = vpop.permute.xlu0 %169 }
 0x195   :  { %v240_v9 = vsel %vm239_vm14, %v235_v7, %v170_v8 }
 0x196   :  { %v318_v13 = vrot.slane %v314_v43, 6  ;;  %v245_v14 = vsel %vm745_vm0, %v240_v9, %v193_v6 }
 0x197   :  { %v250_v15 = vsel %vm249_vm1, %v245_v14, %v213_v44 }
 0x198   :  { %v255_v17 = vsel %vm254_vm3, %v250_v15, 1.0  ;;  %v319_v18 = vsel %vm120_vm7, %v317_v10, %v318_v13  ;;  %vm746_vm7 = vmmov %vm745_vm0 }
 0x199   :  { %400 = vmatmul.msk.f32.vlgmr.msra.gmra.mxu0 %vm268_vm2, %v255_v17  ;;  %320 = vrot.lane.b32.xlu0 %v319_v18, %s470_s6 }
 0x19b   :  { %v111_v24 = vpop.permute.xlu1 %110 }
 0x19c   :  { %v226_v26 = vsel %vm224_vm11, %v650_v38, %v111_v24 }
 0x19d   :  { %v231_v30 = vsel %vm229_vm12, %v226_v26, %v131_v25 }
 0x1a1   :  { %151 = vrot.lane.b32.xlu0 %v146_v19, %s468_s4  ;;  %s474_s4 = smov 4  }
 0x1a3   :  { %v172_v37 = vpop.permute.xlu1 %171 }
 0x1a9   :  { %214 = vrot.lane.b32.xlu0 %v557_v33, %s473_s9  ;;  %v406_v33 = vsel %vm357_vm4, 1.0, %v467_v16  ;;  %s382_s9 = sshll.u32 %s475_s2, 4  ;;  %s383_s9 = int_to_ptr.vmem [resolvable:$true] %s382_s9 }
 0x1aa   :  { %361 = vrot.lane.b32.xlu1 %v406_v33, %s474_s4 }
 0x20b   :  { %v321_v23 = vpop.permute.xlu0 %320 }
 0x213   :  { %v152_v29 = vpop.permute.xlu0 %151 }
 0x214   :  { %v236_v32 = vsel %vm234_vm13, %v231_v30, %v152_v29 }
 0x215   :  { %v241_v12 = vsel %vm239_vm14, %v236_v32, %v172_v37 }
 0x216   :  { %v301_v36 = vpop.f32.mrf.mxu0  ;;  %v246_v41 = vsel %vm746_vm7, %v241_v12, %v195_v39 }
 0x217   :  { %v312_v11 = vmax.f32 %v301_v36, 0.0 }
 0x219   :  { %v323_v16 = vsel %vm224_vm11, %v312_v11, %v321_v23 }
 0x21a   :  { %v324_v40 = vsel %vm229_vm12, %v323_v16, 1.0 }
 0x21b   :  { %405 = vmatmul.msk.f32.vlgmr.msra.gmra.mxu1 %vm328_vm5, %v324_v40  ;;  %v215_v38 = vpop.permute.xlu0 %214 }
 0x21c   :  { %v251_v42 = vsel %vm249_vm1, %v246_v41, %v215_v38  ;;  %v362_v46 = vpop.permute.xlu1 %361 }
 0x21d   :  { %v256_v45 = vsel %vm254_vm3, %v251_v42, 1.0  ;;  %v365_v47 = vsel %vm364_vm8, %v406_v33, %v362_v46 }
 0x21e   :  { %401 = vmatmul.msk.f32.vlgmr.msra.gmra.mxu2 %vm268_vm2, %v256_v45 }
 0x298   :  { %v352_v48 = vpop.f32.mrf.mxu1 }
 0x299   :  { %v366_v49 = vmul.f32 %v365_v47, %v352_v48 }
 0x29b   :  { %v368_v50 = vsel %vm367_vm9, %v366_v49, 0.0 }
 0x29c   :  { %v369_v51 = vrot.slane %v368_v50, 4 }
 0x29e   :  { %v370_v52 = vadd.f32 %v369_v51, %v368_v50 }
 0x2a0   :  { %v371_v53 = vrot.slane %v370_v52, 2 }
 0x2a1   :  { %v304_v54 = vpop.f32.mrf.mxu2 }
 0x2a2   :  { %v372_v55 = vadd.f32 %v371_v53, %v370_v52 }
 0x2a4   :  { %v373_v56 = vrot.slane %v372_v55, 1 }
 0x2a6   :  { %v374_v57 = vadd.f32 %v373_v56, %v372_v55 }
 0x2a8   :  { %376 = vst.msk [vmem:[#allocation2] sm:$0x1] %vm375_vm10, %v374_v57 }
 0x2a9   :  { %387 = dma.vmem_to_hbm [thread:$0]  %s383_s9, 16, %s385_s15, [#allocation3]  }
 0x2aa   :  { %463 = dma.done.wait [#allocation3], 16  }
 0x2ab   :  { %464 = vsyncadd [#allocation3], 4294967280 }
 0x2ac   :  { %392 = vsyncpa [#allocation3], 1 }

</bundles_post_ra>
